<compile_context>
chip_gen: v6e
topology: v6e:2x2x1
jax: 0.10.0
libtpu: 0.0.40
codegen_flags: <defaults>
</compile_context>

<pallas_src>
import functools
import math

import jax
import jax.numpy as jnp
from jax.experimental import pallas as pl
from jax.experimental.pallas import tpu as pltpu


def _attn_scorer_kernel(x_ref, w_eff_t_ref, b_eff_t_ref, out_ref, *, binarize):
    x = x_ref[...].astype(jnp.float32)                     # (tile_L, E)

    # logits^T = W_eff^T @ x^T + b_eff^T  -> (S, tile_L); 1/sqrt(E) already folded.
    logits_t = jax.lax.dot_general(
        w_eff_t_ref[...], x, (((1,), (1,)), ((), ())),
        preferred_element_type=jnp.float32)                # (S, tile_L)
    logits_t = logits_t + b_eff_t_ref[...]                 # (S, 1) lane-broadcast

    # Softmax over the key axis = sublane axis 0 (S rows -> plain VPU max/add).
    m = jnp.max(logits_t, axis=0, keepdims=True)           # (1, tile_L)
    e = jnp.exp(logits_t - m)
    s = jnp.sum(e, axis=0, keepdims=True)
    scores_t = e * pl.reciprocal(s, approx=True)           # divide on the EUP slot

    if binarize:
        scores_t = jnp.round(scores_t)                     # STE forward value

    out_ref[...] = scores_t                                # lane-dense (S, tile_L) store


def prepare_attn_scorer_params(params):
    """Fold all parameter-only projections into tiny effective weights, once,
    outside the per-call hot path (cache/reuse the result across calls)."""
    in_proj_w = params["in_proj_weight"].astype(jnp.float32)   # (3E, E)
    in_proj_b = params["in_proj_bias"].astype(jnp.float32)     # (3E,)
    keyvalue = params["keyvalue"].astype(jnp.float32)          # (S, E)
    E = in_proj_w.shape[1]

    wq = in_proj_w[:E]                                         # (E, E)
    wk = in_proj_w[E:2 * E]                                    # (E, E)
    bq = in_proj_b[:E]                                         # (E,)
    bk = in_proj_b[E:2 * E]                                    # (E,)

    # k projection depends only on parameters -> hoisted out of the kernel.
    k = keyvalue @ wk.T + bk[None, :]                          # (S, E)
    scale = 1.0 / math.sqrt(E)
    # logits = (x @ Wq.T + bq) @ k.T * scale = x @ W_eff + b_eff.
    # Transposed ("lane-dense L") form consumed by the kernel:
    w_eff_t = (k @ wq) * scale                                 # (S, E)
    b_eff_t = (k @ bq[:, None]) * scale                        # (S, 1)
    return {"w_eff_t": w_eff_t, "b_eff_t": b_eff_t}


def attn_scorer_forward(inputs, prepared, binarize_scores=True, *, tile_l_max=1024):
    """inputs: (L, ...) with prod(trailing dims) == emb_len (== torch flatten(1))."""
    L = inputs.shape[0]
    x2d = inputs.reshape(L, -1).astype(jnp.float32)            # (L, E)
    E = x2d.shape[1]

    w_eff_t = prepared["w_eff_t"]                              # (S, E)
    b_eff_t = prepared["b_eff_t"]                              # (S, 1)
    S = w_eff_t.shape[0]

    tile_l = L if L <= tile_l_max else tile_l_max              # 1024 % 8 == 1024 % 128 == 0
    grid = (pl.cdiv(L, tile_l),)

    kernel = functools.partial(_attn_scorer_kernel, binarize=binarize_scores)

    scores_t = pl.pallas_call(
        kernel,
        out_shape=jax.ShapeDtypeStruct((S, L), jnp.float32),
        grid=grid,
        in_specs=[
            pl.BlockSpec((tile_l, E), lambda i: (i, 0)),       # streamed x tiles
            pl.BlockSpec((S, E), lambda i: (0, 0)),            # resident W_eff^T
            pl.BlockSpec((S, 1), lambda i: (0, 0)),            # resident b_eff^T
        ],
        out_specs=pl.BlockSpec((S, tile_l), lambda i: (0, i)), # lane-dense in L
        compiler_params=pltpu.CompilerParams(
            dimension_semantics=("parallel",)),
    )(x2d, w_eff_t, b_eff_t)

    return scores_t.T                                          # (L, S), matches PyTorch


def _reference_scores(inputs, params, binarize_scores):
    """Pure-JAX reference mirroring nn.MultiheadAttention(E, 1) attn weights."""
    L = inputs.shape[0]
    x = inputs.reshape(L, -1).astype(jnp.float32)
    E = x.shape[1]
    wq = params["in_proj_weight"][:E].astype(jnp.float32)
    wk = params["in_proj_weight"][E:2 * E].astype(jnp.float32)
    bq = params["in_proj_bias"][:E].astype(jnp.float32)
    bk = params["in_proj_bias"][E:2 * E].astype(jnp.float32)
    kv = params["keyvalue"].astype(jnp.float32)
    q = x @ wq.T + bq[None, :]
    k = kv @ wk.T + bk[None, :]
    logits = (q @ k.T) / math.sqrt(E)
    scores = jax.nn.softmax(logits, axis=-1)
    if binarize_scores:
        scores = jnp.round(scores)
    return scores


if __name__ == "__main__":
    emb_len = 128
    n_heads = 2
    L, C, H, W = 8, 2, 8, 8          # C*H*W == emb_len, so flatten(1) -> (8, 128)

    key = jax.random.PRNGKey(0)
    k_in, k_w, k_b, k_kv = jax.random.split(key, 4)

    inputs = jax.random.normal(k_in, (L, C, H, W), dtype=jnp.float32)

    # Synthetic params, shapes matching nn.MultiheadAttention(128, 1) + keyvalue.
    bound = 1.0 / math.sqrt(emb_len)
    params = {
        "in_proj_weight": jax.random.uniform(
            k_w, (3 * emb_len, emb_len), jnp.float32, -bound, bound),
        "in_proj_bias": jax.random.uniform(
            k_b, (3 * emb_len,), jnp.float32, -bound, bound),
        "keyvalue": jax.random.uniform(
            k_kv, (n_heads, emb_len), jnp.float32, 0.0, 1.0),
    }

    prepared = prepare_attn_scorer_params(params)

    # Continuous scores: validate against the pure-JAX reference.
    soft = jax.block_until_ready(
        attn_scorer_forward(inputs, prepared, binarize_scores=False))
    ref = _reference_scores(inputs, params, binarize_scores=False)
    assert soft.shape == (L, n_heads) and soft.dtype == jnp.float32
    assert bool(jnp.allclose(soft, ref, atol=1e-2, rtol=1e-2)), "mismatch vs reference"

    # Module default: binarized (straight-through) scores.
    out = jax.block_until_ready(
        attn_scorer_forward(inputs, prepared, binarize_scores=True))
    assert out.shape == (L, n_heads) and out.dtype == jnp.float32
    assert bool(jnp.all((out == 0.0) | (out == 1.0)))
    # TODO(synk): backward of the straight-through estimator is out of scope
    # (forward value only, as in the reference forward).
    print("KERNEL_OK")
</pallas_src>

<mosaic_0001>
module attributes {stable_mosaic.version = 11 : i64} {
  func.func @_attn_scorer_kernel(%arg0: i32, %arg1: memref<8x128xf32, #tpu.memory_space<vmem>>, %arg2: memref<2x128xf32, #tpu.memory_space<vmem>>, %arg3: memref<2x1xf32, #tpu.memory_space<vmem>>, %arg4: memref<2x8xf32, #tpu.memory_space<vmem>>) attributes {dimension_semantics = [#tpu.dimension_semantics<parallel>], iteration_bounds = array<i64: 1>, scalar_prefetch = 0 : i64, scratch_operands = 0 : i64, tpu.core_type = #tpu.core_type<tc>, window_params = [{transform_indices = @transform_0, window_bounds = array<i64: 8, 128>}, {pipeline_mode = #tpu.pipeline_mode<synchronous>, transform_indices = @transform_1, window_bounds = array<i64: 2, 128>}, {pipeline_mode = #tpu.pipeline_mode<synchronous>, transform_indices = @transform_2, window_bounds = array<i64: 2, 1>}, {transform_indices = @transform_3, window_bounds = array<i64: 2, 8>}]} {
    %c0 = arith.constant 0 : index
    %c0_0 = arith.constant 0 : index
    %0 = vector.load %arg1[%c0, %c0_0] : memref<8x128xf32, #tpu.memory_space<vmem>>, vector<8x128xf32>
    %c0_1 = arith.constant 0 : index
    %c0_2 = arith.constant 0 : index
    %1 = vector.load %arg2[%c0_1, %c0_2] : memref<2x128xf32, #tpu.memory_space<vmem>>, vector<2x128xf32>
    %cst = arith.constant dense<0.000000e+00> : vector<2x8xf32>
    %2 = tpu.matmul %1, %0, %cst {dimension_numbers = #tpu.dot_dimension_numbers<[1], [1], [0], [0], [0, 0, 1, 0], [], []>} : vector<2x128xf32>, vector<8x128xf32>, vector<2x8xf32> -> vector<2x8xf32>
    %c0_3 = arith.constant 0 : index
    %c0_4 = arith.constant 0 : index
    %3 = vector.load %arg3[%c0_3, %c0_4] : memref<2x1xf32, #tpu.memory_space<vmem>>, vector<2x1xf32>
    %4 = vector.broadcast %3 : vector<2x1xf32> to vector<2x8xf32>
    %5 = arith.addf %2, %4 : vector<2x8xf32>
    %cst_5 = arith.constant dense<0xFF800000> : vector<8xf32>
    %6 = vector.multi_reduction <maximumf>, %5, %cst_5 [0] : vector<2x8xf32> to vector<8xf32>
    %7 = vector.shape_cast %6 : vector<8xf32> to vector<1x8xf32>
    %8 = vector.broadcast %7 : vector<1x8xf32> to vector<2x8xf32>
    %9 = arith.subf %5, %8 : vector<2x8xf32>
    %10 = math.exp %9 : vector<2x8xf32>
    %cst_6 = arith.constant dense<0.000000e+00> : vector<8xf32>
    %11 = vector.multi_reduction <add>, %10, %cst_6 [0] : vector<2x8xf32> to vector<8xf32>
    %12 = vector.shape_cast %11 : vector<8xf32> to vector<1x8xf32>
    %13 = tpu.reciprocal %12 {approx = true} : vector<1x8xf32> -> vector<1x8xf32>
    %14 = vector.broadcast %13 : vector<1x8xf32> to vector<2x8xf32>
    %15 = arith.mulf %10, %14 : vector<2x8xf32>
    %c0_7 = arith.constant 0 : index
    %c0_8 = arith.constant 0 : index
    %16 = vector.load %arg4[%c0_7, %c0_8] : memref<2x8xf32, #tpu.memory_space<vmem>>, vector<2x8xf32>
    tpu.vector_store %arg4[%c0_7, %c0_8], %15 {strides = array<i32>} : memref<2x8xf32, #tpu.memory_space<vmem>>, vector<2x8xf32>,
    return
  }
  func.func @transform_0(%arg0: i32) -> (i32, i32) {
    %c0_i32 = arith.constant 0 : i32
    %c0_i32_0 = arith.constant 0 : i32
    return %arg0, %c0_i32 : i32, i32
  }
  func.func @transform_1(%arg0: i32) -> (i32, i32) {
    %c0_i32 = arith.constant 0 : i32
    %c0_i32_0 = arith.constant 0 : i32
    %c0_i32_1 = arith.constant 0 : i32
    return %c0_i32, %c0_i32_0 : i32, i32
  }
  func.func @transform_2(%arg0: i32) -> (i32, i32) {
    %c0_i32 = arith.constant 0 : i32
    %c0_i32_0 = arith.constant 0 : i32
    %c0_i32_1 = arith.constant 0 : i32
    return %c0_i32, %c0_i32_0 : i32, i32
  }
  func.func @transform_3(%arg0: i32) -> (i32, i32) {
    %c0_i32 = arith.constant 0 : i32
    %c0_i32_0 = arith.constant 0 : i32
    return %c0_i32, %arg0 : i32, i32
  }
}

</mosaic_0001>

<bundles_post_ra>
// kernel: tpu_custom_call.1
= control target key start
LH: loop header
LB: loop body
LE: loop exit
PB: predicated region body
PF: predicated region fallthrough
CT: control target
= control target key end

     0   :  { %8 = vsyncpa [#allocation3], 0  ;;  %s242_s0 = inlined_call_operand.hbm [shape: f32[8,128], index: 0, kind: input, shape index: {}]   ;;  %s243_s1 = inlined_call_operand.vmem [shape: f32[2,128], index: 1, kind: input, shape index: {}]   ;;  %s244_s2 = inlined_call_operand.vmem [shape: f32[2,1], index: 2, kind: input, shape index: {}]   ;;  %s245_s3 = inlined_call_operand.hbm [shape: f32[2,8], index: 3, kind: output, shape index: {}]  }
   0x1   :  { %9 = vsyncpa [#allocation4], 0  ;;  %s202_s12 = smov [#allocation2]  }
   0x2   :  { %s16_s13 = sshll.u32 %s202_s12, 4  ;;  %s17_s13 = int_to_ptr.vmem [resolvable:$true] %s16_s13 }
   0x3   :  { %s166_s14 = scalar_lea.vmem %s17_s13, 128  ;;  %p171_p1 = scmp.lt.s32.totalorder %s17_s13, %s17_s13 }
   0x4   :  { %p167_p0 = scmp.ne.s32.totalorder %s17_s13, %s166_s14  ;;  %p172_p2 = scmp.lt.s32.totalorder %s166_s14, %s166_s14 }
   0x6   :  { %p173_p3 = por %p172_p2, %p171_p1 }
   0x8   :  { %p174_p4 = pnand %p173_p3, %p167_p0 }
   0xa   :  { %177 = shalt.err (!%p174_p4)
}
   0xb   :  { %19 = dma.hbm_to_vmem [thread:$0]  %s242_s0, 128, %s17_s13, [#allocation3]  }
   0xc   :  { %198 = dma.done.wait [#allocation3], 128  }
   0xd   :  { %199 = vsyncadd [#allocation3], 4294967168  ;;  %v203_v0 = vmov 0.0   ;;  %vm204_vm0 = vmmov 0   ;;  %v205_v1 = vmov 0   ;;  %v27_v2 = vld [vmem:[#allocation2] sm:$0xff] }
   0xe   :  { %143 = vmatprep.subr.mxu0 %v203_v0  ;;  %145 = vmatprep.mubr.msk.f32.mxu0 %vm204_vm0, %v203_v0  ;;  %v29_v3 = vld [vmem:[%s244_s2] sm:$0x3]  ;;  %vm105_vm1 = vcmask 58368   ;;  %s206_s0 = smov [#allocation5]  }
   0xf   :  { %153 = vset.pattern.permute.xlu0 %v205_v1  ;;  %144 = vmatpush3.xpose.msra.mxu0 %v27_v2  ;;  %v28_v4 = vld [vmem:[%s243_s1] sm:$0x3]  ;;  %s132_s1 = sshll.u32 %s206_s0, 4  ;;  %s133_s1 = int_to_ptr.vmem [resolvable:$true] %s132_s1 }
  0x10   :  { %32 = vperm.xlu0 %153, %v29_v3   ;;  %s178_s2 = scalar_lea.vmem %s133_s1, 32  ;;  %p183_p6 = scmp.lt.s32.totalorder %s133_s1, %s133_s1 }
  0x11   :  { %p179_p5 = scmp.ne.s32.totalorder %s133_s1, %s178_s2  ;;  %p184_p7 = scmp.lt.s32.totalorder %s178_s2, %s178_s2 }
  0x12   :  { %146 = vmatmul.mubr.f32.vlgmr.msra.gmra.mxu0 %v28_v4 }
  0x13   :  { %p185_p8 = por %p184_p7, %p183_p6 }
  0x15   :  { %p186_p9 = pnand %p185_p8, %p179_p5 }
  0x8b   :  { %v33_v5 = vpop.permute.xlu0 %32 }
  0xd2   :  { %v101_v6 = vpop.f32.mrf.mxu0 }
  0xd3   :  { %v102_v7 = vadd.f32 %v101_v6, %v33_v5 }
  0xd4   :  { %v147_v8 = vpop.f32.mrf.mxu0 }
  0xd5   :  { %v106_v9 = vsel %vm105_vm1, %v102_v7, -inf }
  0xd6   :  { %v107_v10 = vrot.slane %v106_v9, 4 }
  0xd8   :  { %v108_v11 = vmax.f32 %v106_v9, %v107_v10 }
  0xda   :  { %v109_v12 = vrot.slane %v108_v11, 2 }
  0xdc   :  { %v110_v13 = vmax.f32 %v108_v11, %v109_v12 }
  0xde   :  { %v111_v14 = vrot.slane %v110_v13, 1 }
  0xe0   :  { %v112_v15 = vmax.f32 %v110_v13, %v111_v14 }
  0xe2   :  { %v113_v16 = vsub.f32 %v102_v7, %v112_v15 }
  0xe4   :  { %v114_v17 = vmul.f32 1.442695, %v113_v16 }
  0xe6   :  { %154 = vpow2.f32 %v114_v17 }
  0xf3   :  { %v155_v18 = vpop.eup %154 }
  0xf4   :  { %v116_v19 = vsel %vm105_vm1, %v155_v18, 0.0 }
  0xf5   :  { %v117_v20 = vrot.slane %v116_v19, 4 }
  0xf7   :  { %v118_v21 = vadd.f32 %v117_v20, %v116_v19 }
  0xf9   :  { %v119_v22 = vrot.slane %v118_v21, 2 }
  0xfb   :  { %v120_v23 = vadd.f32 %v119_v22, %v118_v21 }
  0xfd   :  { %v121_v24 = vrot.slane %v120_v23, 1 }
  0xff   :  { %v122_v25 = vadd.f32 %v121_v24, %v120_v23 }
 0x101   :  { %156 = vrcp.f32 %v122_v25 }
 0x10e   :  { %v157_v26 = vpop.eup %156 }
 0x10f   :  { %v124_v27 = vmul.f32 %v157_v26, %v155_v18 }
 0x111   :  { %125 = vst.msk [vmem:[#allocation5] sm:$0x3] %vm105_vm1, %v124_v27 }
 0x112   :  { %189 = shalt.err (!%p186_p9)
}
 0x113   :  { %135 = dma.vmem_to_hbm [thread:$0]  %s133_s1, 32, %s245_s3, [#allocation4]  }
 0x114   :  { %200 = dma.done.wait [#allocation4], 32  }
 0x115   :  { %201 = vsyncadd [#allocation4], 4294967264 }
 0x116   :  { %139 = vsyncpa [#allocation3], 1 }
 0x117   :  { %140 = vsyncpa [#allocation4], 1 }

</bundles_post_ra>
